<compile_context>
chip_gen: v6e
topology: v6e:2x2x1
jax: 0.10.0
libtpu: 0.0.40
codegen_flags: <defaults>
</compile_context>

<pallas_src>
import functools

import jax
import jax.numpy as jnp
from jax.experimental import pallas as pl
from jax.experimental.pallas import tpu as pltpu


def _round_up(x, m):
    return ((x + m - 1) // m) * m


# ----------------------------------------------------------------------------
# Pallas kernel: fused min/max quantization + 1-D valid convolution tile
# ----------------------------------------------------------------------------
def _conv1d_q_kernel(params_ref, x_ref, w_ref, b_ref, o_ref, *,
                     K, TL, W, apply_quant, compute_dtype):
    """One (batch, L-tile) grid step.

    params_ref : SMEM (3,) f32    [min_val, n_levels/scale, scale/n_levels]
    x_ref      : VMEM (Cin, L_pad)   whole padded input row (resident / batch)
    w_ref      : VMEM (K, Cout, Cin) tap-major weights (compute_dtype)
    b_ref      : VMEM (Cout, 1)      bias (f32)
    o_ref      : VMEM (Cout, TL)     lane-dense output tile (f32)
    """
    l = pl.program_id(1)
    start = pl.multiple_of(l * TL, 128)        # TL is a multiple of 128
    win = x_ref[:, pl.ds(start, W)]            # (Cin, W) f32, W = TL + halo

    if apply_quant:
        mn = params_ref[0]
        q_mul = params_ref[1]                  # (2^ak - 1) / scale
        deq_mul = params_ref[2]                # scale / (2^ak - 1)
        # min_max_quantize: hoisted divides -> multiplies only (VALU).
        win = jnp.floor((win - mn) * q_mul + 0.5) * deq_mul + mn

    win = win.astype(compute_dtype)
    w = w_ref[...]                             # (K, Cout, Cin)

    # out[co, t] = sum_k sum_ci w[k, co, ci] * x[ci, start + t + k]
    acc = jnp.dot(w[0], win[:, 0:TL], preferred_element_type=jnp.float32)
    for k in range(1, K):                      # static unroll (K is small)
        acc = acc + jnp.dot(w[k], win[:, k:k + TL],
                            preferred_element_type=jnp.float32)

    o_ref[...] = (acc + b_ref[...]).astype(o_ref.dtype)


# ----------------------------------------------------------------------------
# Wrapper
# ----------------------------------------------------------------------------
def conv1d_q_forward(x, weight, bias, *, QA_flag=False, ak=8,
                     compute_dtype=jnp.bfloat16, tile_l=512):
    """x: (N, Cin, L) f32; weight: (Cout, Cin, K); bias: (Cout,)."""
    N, Cin, L = x.shape
    Cout, Cin_w, K = weight.shape
    assert Cin_w == Cin
    L_out = L - K + 1
    assert L_out >= 1, "input length must be >= kernel size"

    apply_quant_in_kernel = False
    params = jnp.zeros((3,), jnp.float32)
    if QA_flag:
        assert ak >= 1, ak
        if ak == 1:
            # PyTorch min_max_quantize bits==1 branch kept verbatim
            # (sign(x) - 1); done in the wrapper, no in-kernel rescale.
            x = jnp.sign(x) - 1.0
        else:
            n_levels = float(2.0 ** ak - 1.0)
            mn = jnp.min(x)
            mx = jnp.max(x)
            scale = mx - mn
            # Guard: constant input gives 0/0 (NaN) in the PyTorch code; here
            # it degrades gracefully to the identity instead.
            scale = jnp.where(scale > 0, scale, 1.0)
            params = jnp.stack(
                [mn, n_levels / scale, scale / n_levels]).astype(jnp.float32)
            apply_quant_in_kernel = True

    # Lane-aligned tiling of the output length.
    TL = _round_up(min(tile_l, _round_up(L_out, 128)), 128)
    num_tiles = pl.cdiv(L_out, TL)
    halo = _round_up(K - 1, 128) if K > 1 else 0   # lane-aligned window slack
    W = TL + halo
    L_pad = num_tiles * TL + halo

    x_pad = jnp.pad(x.astype(jnp.float32), ((0, 0), (0, 0), (0, L_pad - L)))
    w_t = jnp.transpose(weight, (2, 0, 1)).astype(compute_dtype)  # (K,Cout,Cin)
    b_col = bias.reshape(Cout, 1).astype(jnp.float32)

    kernel = functools.partial(
        _conv1d_q_kernel, K=K, TL=TL, W=W,
        apply_quant=apply_quant_in_kernel, compute_dtype=compute_dtype)

    out = pl.pallas_call(
        kernel,
        out_shape=jax.ShapeDtypeStruct((N, Cout, num_tiles * TL), jnp.float32),
        grid=(N, num_tiles),
        in_specs=[
            pl.BlockSpec(memory_space=pltpu.MemorySpace.SMEM),          # params
            pl.BlockSpec((None, Cin, L_pad), lambda n, l: (n, 0, 0)),   # x row
            pl.BlockSpec((K, Cout, Cin), lambda n, l: (0, 0, 0)),       # weights
            pl.BlockSpec((Cout, 1), lambda n, l: (0, 0)),               # bias
        ],
        out_specs=pl.BlockSpec((None, Cout, TL), lambda n, l: (n, 0, l)),
        compiler_params=pltpu.CompilerParams(
            dimension_semantics=("parallel", "parallel")),
    )(params, x_pad, w_t, b_col)

    return out[:, :, :L_out]


class Conv1DQ:
    """JAX/Pallas equivalent of LiMuSE.Conv1D_Q (forward only)."""

    def __init__(self, input_channel, hidden_channel, kernel,
                 QA_flag=False, ak=8, key=None, compute_dtype=jnp.bfloat16):
        self.QA_flag = QA_flag
        self.ak = ak
        self.kernel = kernel
        self.cin = input_channel
        self.cout = hidden_channel
        self.compute_dtype = compute_dtype
        key = jax.random.PRNGKey(0) if key is None else key
        kw, kb = jax.random.split(key)
        # Deterministic synthetic params (same shapes as nn.Conv1d).
        self.weight = 0.1 * jax.random.normal(
            kw, (hidden_channel, input_channel, kernel), jnp.float32)
        self.bias = 0.1 * jax.random.normal(kb, (hidden_channel,), jnp.float32)

    def __call__(self, x):
        if x.ndim not in (2, 3):
            raise RuntimeError("Conv1DQ accepts 2/3D tensor as input")
        squeeze = x.ndim == 2
        if squeeze:                       # unbatched (Cin, L), like PyTorch
            x = x[None]
        out = conv1d_q_forward(
            x, self.weight, self.bias, QA_flag=self.QA_flag, ak=self.ak,
            compute_dtype=self.compute_dtype)
        if squeeze:
            out = out[0]
        return out


# ----------------------------------------------------------------------------
# Reference (pure JAX) for sanity checking
# ----------------------------------------------------------------------------
def _ref_forward(mod, x):
    if x.ndim == 2:
        x = x[None]
    xq = x
    if mod.QA_flag:
        if mod.ak == 1:
            xq = jnp.sign(x) - 1.0
        else:
            n = 2.0 ** mod.ak - 1.0
            mn, mx = jnp.min(x), jnp.max(x)
            r = (x - mn) / (mx - mn)
            xq = jnp.floor(r * n + 0.5) / n * (mx - mn) + mn
    out = jax.lax.conv_general_dilated(
        xq, mod.weight, window_strides=(1,), padding="VALID",
        dimension_numbers=("NCH", "OIH", "NCH"),
        precision=jax.lax.Precision.HIGHEST)
    return out + mod.bias[None, :, None]


if __name__ == "__main__":
    # Small shapes consistent with the module's forward:
    # batch=2, input_channel=4, length=16, hidden_channel=32, kernel=3.
    key = jax.random.PRNGKey(0)
    kx, kp = jax.random.split(key)
    x = jax.random.normal(kx, (2, 4, 16), jnp.float32)

    # Default fast path: quantization fused, bf16 MXU dot, f32 accumulate.
    mod_bf16 = Conv1DQ(input_channel=4, hidden_channel=32, kernel=3,
                       QA_flag=True, ak=8, key=kp, compute_dtype=jnp.bfloat16)
    out = jax.block_until_ready(mod_bf16(x))
    ref = _ref_forward(mod_bf16, x)
    assert out.shape == (2, 32, 14), out.shape
    assert jnp.allclose(out, ref, atol=3e-2, rtol=3e-2), \
        float(jnp.max(jnp.abs(out - ref)))

    # f32 compute path: tighter numeric check of the fused quant + conv.
    mod_f32 = Conv1DQ(input_channel=4, hidden_channel=32, kernel=3,
                      QA_flag=True, ak=8, key=kp, compute_dtype=jnp.float32)
    out32 = jax.block_until_ready(mod_f32(x))
    ref32 = _ref_forward(mod_f32, x)
    assert out32.shape == (2, 32, 14), out32.shape
    assert jnp.allclose(out32, ref32, atol=1e-2, rtol=1e-2), \
        float(jnp.max(jnp.abs(out32 - ref32)))

    # Unbatched (2-D) input, no quantization.
    mod_nq = Conv1DQ(input_channel=4, hidden_channel=32, kernel=3,
                     QA_flag=False, key=kp, compute_dtype=jnp.float32)
    out2d = jax.block_until_ready(mod_nq(x[0]))
    ref2d = _ref_forward(mod_nq, x[0])[0]
    assert out2d.shape == (32, 14), out2d.shape
    assert jnp.allclose(out2d, ref2d, atol=1e-2, rtol=1e-2), \
        float(jnp.max(jnp.abs(out2d - ref2d)))

    print("KERNEL_OK")
</pallas_src>

<mosaic_0001>
module attributes {stable_mosaic.version = 11 : i64} {
  func.func @_conv1d_q_kernel(%arg0: i32, %arg1: i32, %arg2: memref<3xf32, #tpu.memory_space<smem>>, %arg3: memref<1x4x256xf32, #tpu.memory_space<vmem>>, %arg4: memref<3x32x4xbf16, #tpu.memory_space<vmem>>, %arg5: memref<32x1xf32, #tpu.memory_space<vmem>>, %arg6: memref<1x32x128xf32, #tpu.memory_space<vmem>>) attributes {dimension_semantics = [#tpu.dimension_semantics<parallel>, #tpu.dimension_semantics<parallel>], iteration_bounds = array<i64: 2, 1>, scalar_prefetch = 0 : i64, scratch_operands = 0 : i64, tpu.core_type = #tpu.core_type<tc>, window_params = [{transform_indices = @transform_0, window_bounds = array<i64: 3>}, {transform_indices = @transform_1, window_bounds = array<i64: 1, 4, 256>}, {pipeline_mode = #tpu.pipeline_mode<synchronous>, transform_indices = @transform_2, window_bounds = array<i64: 3, 32, 4>}, {pipeline_mode = #tpu.pipeline_mode<synchronous>, transform_indices = @transform_3, window_bounds = array<i64: 32, 1>}, {transform_indices = @transform_4, window_bounds = array<i64: 1, 32, 128>}]} {
    %c128_i32 = arith.constant 128 : i32
    %0 = arith.muli %arg1, %c128_i32 : i32
    %1 = tpu.assume_multiple %0, 128 : i32
    %c0 = arith.constant 0 : index
    %c0_0 = arith.constant 0 : index
    %2 = arith.index_cast %1 : i32 to index
    %3 = vector.load %arg3[%c0, %c0_0, %2] : memref<1x4x256xf32, #tpu.memory_space<vmem>>, vector<1x4x256xf32>
    %4 = vector.shape_cast %3 : vector<1x4x256xf32> to vector<4x256xf32>
    %c0_1 = arith.constant 0 : index
    %5 = memref.load %arg2[%c0_1] : memref<3xf32, #tpu.memory_space<smem>>
    %c1 = arith.constant 1 : index
    %6 = memref.load %arg2[%c1] : memref<3xf32, #tpu.memory_space<smem>>
    %c2 = arith.constant 2 : index
    %7 = memref.load %arg2[%c2] : memref<3xf32, #tpu.memory_space<smem>>
    %8 = vector.broadcast %5 : f32 to vector<4x256xf32>
    %9 = arith.subf %4, %8 : vector<4x256xf32>
    %10 = vector.broadcast %6 : f32 to vector<4x256xf32>
    %11 = arith.mulf %9, %10 : vector<4x256xf32>
    %cst = arith.constant 5.000000e-01 : f32
    %12 = vector.broadcast %cst : f32 to vector<4x256xf32>
    %13 = arith.addf %11, %12 : vector<4x256xf32>
    %14 = math.floor %13 : vector<4x256xf32>
    %15 = vector.broadcast %7 : f32 to vector<4x256xf32>
    %16 = arith.mulf %14, %15 : vector<4x256xf32>
    %17 = vector.broadcast %5 : f32 to vector<4x256xf32>
    %18 = arith.addf %16, %17 : vector<4x256xf32>
    %19 = arith.truncf %18 : vector<4x256xf32> to vector<4x256xbf16>
    %c0_2 = arith.constant 0 : index
    %c0_3 = arith.constant 0 : index
    %c0_4 = arith.constant 0 : index
    %20 = vector.load %arg4[%c0_2, %c0_3, %c0_4] : memref<3x32x4xbf16, #tpu.memory_space<vmem>>, vector<3x32x4xbf16>
    %21 = vector.extract_strided_slice %20 {offsets = [0, 0, 0], sizes = [1, 32, 4], strides = [1, 1, 1]} : vector<3x32x4xbf16> to vector<1x32x4xbf16>
    %22 = vector.shape_cast %21 : vector<1x32x4xbf16> to vector<32x4xbf16>
    %23 = vector.extract_strided_slice %19 {offsets = [0, 0], sizes = [4, 128], strides = [1, 1]} : vector<4x256xbf16> to vector<4x128xbf16>
    %cst_5 = arith.constant dense<0.000000e+00> : vector<32x128xf32>
    %24 = tpu.matmul %22, %23, %cst_5 {dimension_numbers = #tpu.dot_dimension_numbers<[1], [0], [0], [1], [0, 0, 1, 1], [], []>} : vector<32x4xbf16>, vector<4x128xbf16>, vector<32x128xf32> -> vector<32x128xf32>
    %25 = vector.extract_strided_slice %20 {offsets = [1, 0, 0], sizes = [1, 32, 4], strides = [1, 1, 1]} : vector<3x32x4xbf16> to vector<1x32x4xbf16>
    %26 = vector.shape_cast %25 : vector<1x32x4xbf16> to vector<32x4xbf16>
    %27 = vector.extract_strided_slice %19 {offsets = [0, 1], sizes = [4, 128], strides = [1, 1]} : vector<4x256xbf16> to vector<4x128xbf16>
    %cst_6 = arith.constant dense<0.000000e+00> : vector<32x128xf32>
    %28 = tpu.matmul %26, %27, %cst_6 {dimension_numbers = #tpu.dot_dimension_numbers<[1], [0], [0], [1], [0, 0, 1, 1], [], []>} : vector<32x4xbf16>, vector<4x128xbf16>, vector<32x128xf32> -> vector<32x128xf32>
    %29 = arith.addf %24, %28 : vector<32x128xf32>
    %30 = vector.extract_strided_slice %20 {offsets = [2, 0, 0], sizes = [1, 32, 4], strides = [1, 1, 1]} : vector<3x32x4xbf16> to vector<1x32x4xbf16>
    %31 = vector.shape_cast %30 : vector<1x32x4xbf16> to vector<32x4xbf16>
    %32 = vector.extract_strided_slice %19 {offsets = [0, 2], sizes = [4, 128], strides = [1, 1]} : vector<4x256xbf16> to vector<4x128xbf16>
    %cst_7 = arith.constant dense<0.000000e+00> : vector<32x128xf32>
    %33 = tpu.matmul %31, %32, %cst_7 {dimension_numbers = #tpu.dot_dimension_numbers<[1], [0], [0], [1], [0, 0, 1, 1], [], []>} : vector<32x4xbf16>, vector<4x128xbf16>, vector<32x128xf32> -> vector<32x128xf32>
    %34 = arith.addf %29, %33 : vector<32x128xf32>
    %c0_8 = arith.constant 0 : index
    %c0_9 = arith.constant 0 : index
    %35 = vector.load %arg5[%c0_8, %c0_9] : memref<32x1xf32, #tpu.memory_space<vmem>>, vector<32x1xf32>
    %36 = vector.broadcast %35 : vector<32x1xf32> to vector<32x128xf32>
    %37 = arith.addf %34, %36 : vector<32x128xf32>
    %c0_10 = arith.constant 0 : index
    %c0_11 = arith.constant 0 : index
    %c0_12 = arith.constant 0 : index
    %38 = vector.load %arg6[%c0_10, %c0_11, %c0_12] : memref<1x32x128xf32, #tpu.memory_space<vmem>>, vector<1x32x128xf32>
    %39 = vector.shape_cast %38 : vector<1x32x128xf32> to vector<32x128xf32>
    %40 = vector.shape_cast %37 : vector<32x128xf32> to vector<1x32x128xf32>
    tpu.vector_store %arg6[%c0_10, %c0_11, %c0_12], %40 {strides = array<i32>} : memref<1x32x128xf32, #tpu.memory_space<vmem>>, vector<1x32x128xf32>,
    return
  }
  func.func @transform_0(%arg0: i32, %arg1: i32) -> i32 {
    %c0_i32 = arith.constant 0 : i32
    %c0_i32_0 = arith.constant 0 : i32
    return %c0_i32 : i32
  }
  func.func @transform_1(%arg0: i32, %arg1: i32) -> (i32, i32, i32) {
    %c0_i32 = arith.constant 0 : i32
    %c0_i32_0 = arith.constant 0 : i32
    %c0_i32_1 = arith.constant 0 : i32
    return %arg0, %c0_i32, %c0_i32_0 : i32, i32, i32
  }
  func.func @transform_2(%arg0: i32, %arg1: i32) -> (i32, i32, i32) {
    %c0_i32 = arith.constant 0 : i32
    %c0_i32_0 = arith.constant 0 : i32
    %c0_i32_1 = arith.constant 0 : i32
    %c0_i32_2 = arith.constant 0 : i32
    return %c0_i32, %c0_i32_0, %c0_i32_1 : i32, i32, i32
  }
  func.func @transform_3(%arg0: i32, %arg1: i32) -> (i32, i32) {
    %c0_i32 = arith.constant 0 : i32
    %c0_i32_0 = arith.constant 0 : i32
    %c0_i32_1 = arith.constant 0 : i32
    return %c0_i32, %c0_i32_0 : i32, i32
  }
  func.func @transform_4(%arg0: i32, %arg1: i32) -> (i32, i32, i32) {
    %c0_i32 = arith.constant 0 : i32
    %c0_i32_0 = arith.constant 0 : i32
    return %arg0, %c0_i32, %arg1 : i32, i32, i32
  }
}

</mosaic_0001>

<bundles_post_ra>
// kernel: tpu_custom_call.1
= control target key start
LH: loop header
LB: loop body
LE: loop exit
PB: predicated region body
PF: predicated region fallthrough
CT: control target
= control target key end

     0   :  { %9 = vsyncpa [#allocation4], 0  ;;  %s1067_s0 = inlined_call_operand.vmem [shape: f32[3], index: 0, kind: input, shape index: {}]   ;;  %s1068_s1 = inlined_call_operand.vmem [shape: f32[2,4,256], index: 1, kind: input, shape index: {}]   ;;  %s1069_s2 = inlined_call_operand.vmem [shape: bf16[3,32,4], index: 2, kind: input, shape index: {}]   ;;  %s1070_s3 = inlined_call_operand.vmem [shape: f32[32,1], index: 3, kind: input, shape index: {}]   ;;  %s1071_s4 = inlined_call_operand.hbm [shape: f32[2,32,128], index: 4, kind: output, shape index: {}]  }
   0x1   :  { %10 = vsyncpa [#allocation3], 0 }
   0x2   :  { %12 = vsyncpa [#allocation3 + $0x1], 0  ;;  %s886_s15 = smov 0   ;;  %s888_s16 = smov 0  }
   0x3   :  { %s890_s17 = smov 0   ;;  %s892_s18 = smov 0  }
   0x4   :  { %s894_s19 = smov 0   ;;  %s896_s20 = smov 0  }
   0x5 LB: > { %s617_s21 = sadd.s32 4294967295, %s852_s20   ;;  %s618_s22 = sadd.s32 4294967294, %s852_s20   ;;  %s852_s20 = sphi %s896_s20, %s18_s20   ;;  %s848_s19 = sphi %s894_s19, %s1080_s19   ;;  %s844_s18 = sphi %s892_s18, %s1079_s18   ;;  %s840_s17 = sphi %s890_s17, %s1078_s17   ;;  %s836_s16 = sphi %s888_s16, %s1077_s16   ;;  %s832_s15 = sphi %s886_s15, %s1076_s15  }
   0x6   : > { %s30_s23 = sadd.s32 1, %s848_s19  ;;  %s128_s24 = sadd.s32 1, %s840_s17 }
   0x7   : > { %p32_p0 = scmp.ge.s32.totalorder %s30_s23, 2  ;;  %p138_p1 = scmp.ne.s32.totalorder %s840_s17, %s836_s16 }
   0x8   : > { %p139_p2 = scmp.eq.s32.totalorder %s617_s21, 1  ;;  %p144_p3 = scmp.ne.s32.totalorder %s836_s16, %s832_s15 }
   0x9   : > { %s1082_s23 = smov (%p32_p0, %s30_s23), 0  ;;  %p145_p5 = scmp.eq.s32.totalorder %s618_s22, 1 }
   0xa   : > { %p926_p4 = por %p139_p2, %p138_p1  ;;  %s123_s26 = ssub.s32 %s848_s19, %s1082_s23 }
   0xb   : > { %p619_p6 = scmp.ge.s32.totalorder %s852_s20, 1  ;;  %p126_p7 = scmp.eq.s32.totalorder %s123_s26, 0 }
   0xc   : > { %p933_p8 = por %p145_p5, %p144_p3  ;;  %p152_p9 = scmp.lt.s32.totalorder %s852_s20, 3 }
   0xd   : > { %s939_s28 = scalar_select %p126_p7, %s840_s17, %s128_s24  }
   0xe   : > { %p941_p10 = pnand %p619_p6, %p152_p9  ;;  %p945_p11 = scmp.eq.s32.totalorder %s617_s21, 0 }
   0xf   : > { %s165_s7 = sshll.u32 %s1067_s0, 4  ;;  %s166_s7 = int_to_ptr.vmem [resolvable:$true] %s165_s7 }
  0x10   : > { %p684_p12 = pneg %p941_p10  ;;  %s757_s8 = scalar_lea.vmem %s166_s7, 16 }
  0x11   : > { %p758_p0 = scmp.ne.s32.totalorder %s166_s7, %s757_s8  ;;  %p765_p5 = scmp.lt.s32.totalorder %s166_s7, %s166_s7 }
  0x12   : > { %p685_p13 = pnand %p945_p11, %p684_p12  ;;  %p766_p6 = scmp.lt.s32.totalorder %s757_s8, %s757_s8 }
  0x14   : > { %p759_p1 = pneg %p685_p13  ;;  %p767_p7 = por %p766_p6, %p765_p5 }
  0x16   : > { %p760_p2 = pnand %p759_p1, %p758_p0 }
  0x18   : > { %p761_p3 = pneg %p760_p2 }
  0x1a   : > { %p768_p9 = pnand %p767_p7, %p761_p3 }
  0x1c   : > { %771 = shalt.err (!%p768_p9)
}
  0x1d   : > { %s854_s9 = smov [#allocation2]   ;;  %192 = sbr.rel (%p941_p10) target bundleno = 407 (0x197), region = 36 }
  0x1e   : > { %687 = dma.vmem_to_smem (!%p685_p13), %s166_s7, 16, %s854_s9, [#allocation4]  }
  0x22   : > { %823 = dma.done.wait (%p945_p11), [#allocation4], 16  }
  0x23   : > { %825 = vsyncadd (%p945_p11), [#allocation4], 4294967280 }
  0x24   : > { %198 = sfence }
  0x25   : > { %p219_p12 = scmp.lt.s32.totalorder %s844_s18, 1  ;;  %s231_s10 = sld [smem:[#allocation2]]  ;;  %v751_v8 = vld [vmem:[%s1069_s2 + $0x10] sm:$0xff]   ;;  %v752_v9 = vld [vmem:[%s1069_s2] sm:$0xff]   ;;  %vm278_vm0 = vcmask 31744   ;;  %vm285_vm1 = vcmask 1041408  }
  0x26   : > { %s627_s11 = sld [smem:[#allocation2 + $0x1]]  ;;  %659 = vmatprep.mubr.msk.bf16.mxu0 %vm278_vm0, %v751_v8  ;;  %665 = vmatprep.mubr.msk.bf16.mxu1 %vm278_vm0, %v752_v9  ;;  %s855_s6 = smov 126   ;;  %v754_v16 = vld [vmem:[%s1069_s2 + $0x8] sm:$0xff]   ;;  %v857_v17 = vmov 0   ;;  %v484_v19 = vld [vmem:[%s1070_s3] sm:$0xff]  ;;  %v486_v20 = vld [vmem:[%s1070_s3 + $0x10] sm:$0xff] }
  0x27   : > { %s220_s12 = scalar_select %p219_p12, %s844_s18, 1  ;;  %750 = vset.pattern.permute.xlu1 %v857_v17  ;;  %v485_v18 = vld [vmem:[%s1070_s3 + $0x8] sm:$0xff]  ;;  %749 = vset.pattern.permute.xlu0 %v857_v17  ;;  %v487_v21 = vld [vmem:[%s1070_s3 + $0x18] sm:$0xff]  ;;  %vm420_vm2 = vcmask 1031168   ;;  %vm276_vm3 = vcmask 1039360   ;;  %v755_v30 = vld [vmem:[%s1069_s2 + $0x20] sm:$0xff]  }
  0x28   : > { %s628_s13 = sld [smem:[#allocation2 + $0x2]]  ;;  %s856_s7 = smov 127   ;;  %v753_v29 = vld [vmem:[%s1069_s2 + $0x18] sm:$0xff]   ;;  %v756_v32 = vld [vmem:[%s1069_s2 + $0x28] sm:$0xff]  }
  0x29   : > { %s646_s14 = sshll.u32 %s220_s12, 3  ;;  %s216_s8 = sand.u32 1, %s836_s16  }
  0x2a   : > { %s223_s24 = scalar_lea.vmem %s1068_s1, %s646_s14  ;;  %s624_s9 = sshll.u32 %s216_s8, 5 }
  0x2b   : > { %v230_v0 = vld [vmem:[%s223_s24] sm:$0xff]  ;;  %v234_v1 = vstv %s231_s10  ;;  %s218_s10 = scalar_lea.vmem [#allocation5], %s624_s9  ;;  %s647_s12 = sshll.u32 %s844_s18, 9 }
  0x2c   : > { %v235_v2 = vsub.f32 %v230_v0, %v234_v1  ;;  %v236_v3 = vstv %s627_s11  ;;  %s531_s11 = sshll.u32 %s218_s10, 4  ;;  %s1018_s21 = scalar_lea.hbm %s1071_s4, %s647_s12  ;;  %s1013_s11 = int_to_ptr.vmem [resolvable:$true] %s531_s11 }
  0x2d   : > { %s1022_s18 = scalar_lea.sflag [#allocation3], %s216_s8  ;;  %s772_s22 = scalar_lea.vmem %s1013_s11, 512 }
  0x2e   : > { %v237_v4 = vmul.f32 %v236_v3, %v235_v2  ;;  %v240_v6 = vstv %s628_s13  ;;  %p773_p10 = scmp.ne.s32.totalorder %s1013_s11, %s772_s22  ;;  %s858_s24 = smov [#allocation5]  }
  0x2f   : > { %s776_s26 = sshll.u32 %s858_s24, 4  ;;  %s777_s26 = int_to_ptr.vmem [resolvable:$false] %s776_s26 }
  0x30   : > { %v238_v5 = vadd.f32 0.5, %v237_v4  ;;  %p774_p11 = pnand %p773_p10, %p926_p4  ;;  %s778_s29 = scalar_lea.vmem %s777_s26, 1024 }
  0x31   : > { %p779_p0 = scmp.lt.s32.totalorder %s1013_s11, %s777_s26  ;;  %p780_p1 = scmp.lt.s32.totalorder %s778_s29, %s772_s22 }
  0x32   : > { %v239_v7 = vfloor.f32 %v238_v5  ;;  %p775_p13 = pneg %p774_p11 }
  0x33   : > { %p781_p2 = por %p780_p1, %p779_p0 }
  0x34   : > { %v241_v10 = vmul.f32 %v240_v6, %v239_v7 }
  0x35   : > { %p782_p3 = pnand %p781_p2, %p775_p13 }
  0x36   : > { %v242_v11 = vadd.f32 %v241_v10, %v234_v1 }
  0x38   : > { %v246_v12 = vpack.c.bf16 %v242_v11, %v242_v11  ;;  %v244_v13 = vcombine.high %v242_v11, %v242_v11 }
  0x3a   : > { %416 = vrot.lane.b32.xlu1 %v246_v12, %s855_s6  ;;  %272 = vrot.lane.b32.xlu0 %v246_v12, %s856_s7  ;;  %v247_v14 = vpack.c.bf16 %v244_v13, %v244_v13  ;;  %v355_v15 = vsel %vm285_vm1, %v246_v12, 0 }
  0x3b   : > { %676 = vmatprep.subr.msk.bf16.mxu1 %vm285_vm1, %v246_v12 }
  0x3c   : > { %664 = vmatpush3.bf16.msra.mxu1 %v355_v15 }
  0x3e   : > { %418 = vrot.lane.b32.xlu1 %v247_v14, %s855_s6  ;;  %274 = vrot.lane.b32.xlu0 %v247_v14, %s856_s7 }
  0x3f   : > { %666 = vmatmul.mubr.msk.bf16.vlgmr.msra.gmra.mxu1 %vm278_vm0, %v754_v16 }
  0x42   : > { %495 = vperm.xlu1 %750, %v485_v18   ;;  %490 = vperm.xlu0 %749, %v484_v19  }
  0x46   : > { %500 = vperm.xlu1 %750, %v486_v20   ;;  %505 = vperm.xlu0 %749, %v487_v21  }
  0xac   : > { %v417_v22 = vpop.permute.xlu1 %416  ;;  %v273_v23 = vpop.permute.xlu0 %272 }
  0xb0   : > { %v419_v24 = vpop.permute.xlu1 %418  ;;  %v275_v25 = vpop.permute.xlu0 %274 }
  0xb1   : > { %v421_v26 = vsel %vm420_vm2, %v417_v22, %v419_v24  ;;  %v277_v27 = vsel %vm276_vm3, %v273_v23, %v275_v25 }
  0xb2   : > { %675 = vmatprep.subr.msk.bf16.mxu0 %vm285_vm1, %v277_v27  ;;  %v287_v28 = vsel %vm285_vm1, %v277_v27, 0  ;;  %v429_v31 = vsel %vm285_vm1, %v421_v26, 0 }
  0xb3   : > { %658 = vmatpush3.bf16.msra.mxu0 %v287_v28 }
  0xb4   : > { %677 = vmatprep.subr.msk.bf16.mxu0 %vm285_vm1, %v421_v26 }
  0xb6   : > { %660 = vmatmul.mubr.msk.bf16.vlgmr.msra.gmra.mxu0 %vm278_vm0, %v753_v29 }
  0xb7   : > { %670 = vmatpush3.bf16.msra.mxu0 %v429_v31  ;;  %671 = vmatprep.mubr.msk.bf16.mxu0 %vm278_vm0, %v755_v30 }
  0xbd   : > { %v496_v35 = vpop.permute.xlu1 %495  ;;  %v491_v42 = vpop.permute.xlu0 %490 }
  0xbe   : > { %672 = vmatmul.mubr.msk.bf16.vlgmr.msra.gmra.mxu0 %vm278_vm0, %v756_v32 }
  0xc1   : > { %v501_v44 = vpop.permute.xlu1 %500  ;;  %v506_v56 = vpop.permute.xlu0 %505 }
  0xff   : > { %v667_v33 = vpop.f32.mrf.mxu1 }
 0x101   : > { %v391_v37 = vpop.f32.mrf.mxu1 }
 0x103   : > { %v668_v39 = vpop.f32.mrf.mxu1 }
 0x105   : > { %v394_v47 = vpop.f32.mrf.mxu1 }
 0x176   : > { %v661_v34 = vpop.f32.mrf.mxu0 }
 0x177   : > { %v400_v41 = vadd.f32 %v667_v33, %v661_v34 }
 0x178   : > { %v323_v36 = vpop.f32.mrf.mxu0 }
 0x179   : > { %v392_v45 = vadd.f32 %v391_v37, %v323_v36 }
 0x17a   : > { %v662_v38 = vpop.f32.mrf.mxu0 }
 0x17b   : > { %v403_v49 = vadd.f32 %v668_v39, %v662_v38 }
 0x17c   : > { %v326_v40 = vpop.f32.mrf.mxu0 }
 0x17d   : > { %v395_v53 = vadd.f32 %v394_v47, %v326_v40 }
 0x17e   : > { %v673_v43 = vpop.f32.mrf.mxu0 }
 0x17f   : > { %v482_v46 = vadd.f32 %v673_v43, %v400_v41 }
 0x180   : > { %v465_v48 = vpop.f32.mrf.mxu0 }
 0x181   : > { %v510_v50 = vadd.f32 %v501_v44, %v482_v46  ;;  %v480_v51 = vadd.f32 %v465_v48, %v392_v45 }
 0x182   : > { %v674_v52 = vpop.f32.mrf.mxu0 }
 0x183   : > { %514 = vst [vmem:[%s218_s10 + $0x10] sm:$0xff] %v510_v50  ;;  %v508_v54 = vadd.f32 %v491_v42, %v480_v51  ;;  %v483_v55 = vadd.f32 %v674_v52, %v403_v49 }
 0x184   : > { %v468_v57 = vpop.f32.mrf.mxu0 }
 0x185   : > { %512 = vst [vmem:[%s218_s10] sm:$0xff] %v508_v54  ;;  %v511_v58 = vadd.f32 %v506_v56, %v483_v55  ;;  %v481_v59 = vadd.f32 %v468_v57, %v395_v53 }
 0x187   : > { %515 = vst [vmem:[%s218_s10 + $0x18] sm:$0xff] %v511_v58  ;;  %v509_v60 = vadd.f32 %v496_v35, %v481_v59 }
 0x189   : > { %513 = vst [vmem:[%s218_s10 + $0x8] sm:$0xff] %v509_v60 }
 0x18a   : > { %785 = shalt.err (!%p782_p3)
}
 0x18b   : > { %s786_s30 = scalar_lea.hbm %s1018_s21, 512  ;;  %s790_s7 = scalar_lea.hbm %s1071_s4, 1024 }
 0x18c   : > { %p787_p5 = scmp.ne.s32.totalorder %s1018_s21, %s786_s30  ;;  %p791_p9 = scmp.lt.s32.totalorder %s1018_s21, %s1071_s4 }
 0x18d   : > { %p792_p12 = scmp.lt.s32.totalorder %s790_s7, %s786_s30 }
 0x18e   : > { %p788_p6 = pnand %p787_p5, %p926_p4 }
 0x18f   : > { %p793_p10 = por %p792_p12, %p791_p9 }
 0x190   : > { %p789_p7 = pneg %p788_p6 }
 0x192   : > { %p794_p11 = pnand %p793_p10, %p789_p7 }
 0x194   : > { %797 = shalt.err (!%p794_p11)
}
 0x195   : > { %s859_s10 = smov 128   ;;  %s860_s12 = smov 8  }
 0x196   : > { %682 = dma.vmem_to_hbm [thread:$0]  (%p926_p4), %s1013_s11, 512, %s1018_s21, %s1022_s18, %s859_s10, %s859_s10, %s860_s12  }
 0x197 PF: > { %p694_p13 = scmp.ge.s32.totalorder %s852_s20, 2  ;;  %s546_s13 = sand.u32 1, %s832_s15  }
 0x198   : > { %s547_s14 = scalar_lea.sflag [#allocation3], %s546_s13 }
 0x199   : > { %p689_p0 = pnand %p694_p13, %p933_p8 }
 0x19b   : > { %p690_p1 = pneg %p689_p0 }
 0x19d   : > { %827 = dma.done.wait (%p690_p1), %s547_s14, 512  }
 0x19e   : > { %829 = vsyncadd (%p690_p1), %s547_s14, 4294966784  ;;  %s18_s20 = sadd.s32 1, %s852_s20   ;;  %s1076_s15 = smov %s836_s16 }
 0x19f   : > { %p15_p2 = scmp.ge.s32.totalorder %s18_s20, 4   ;;  %s1077_s16 = smov %s840_s17 }
 0x1a0   : > { %s1078_s17 = smov %s939_s28  ;;  %s1079_s18 = smov %s848_s19 }
 0x1a1   : > { %s1080_s19 = smov %s1082_s23  ;;  %17 = sbr.rel (!%p15_p2) target bundleno = 5 (0x5), region = 77 }
 0x1a6   :  { %552 = vsyncpa [#allocation3], 1 }
 0x1a7   :  { %554 = vsyncpa [#allocation3 + $0x1], 1 }
 0x1a8   :  { %555 = vsyncpa [#allocation4], 1 }
 0x1a9   :  { %557 = vsyncpa [#allocation4 + $0x1], 1 }

</bundles_post_ra>
